<compile_context>
chip_gen: v7x
topology: tpu7x:2x2x1
jax: 0.10.0
libtpu: 0.0.40
codegen_flags: <defaults>
</compile_context>

<pallas_src>
import math

import jax
import jax.numpy as jnp
from jax import lax
from jax.experimental import pallas as pl
from jax.experimental.pallas import tpu as pltpu

# ----------------------------------------------------------------------------
# Module configuration (mirrors SDFNet.__init__ defaults)
# ----------------------------------------------------------------------------
HASH_CONFIG = {
    "otype": "HashGrid",
    "n_levels": 20,
    "n_features_per_level": 2,   # kernel assumes F == 2 (module default)
    "base_resolution": 32,
    "per_level_scale": 1.5,
    "log2_hashmap_size": 21,
}
HIDDEN_DIM = 64
NUM_LAYERS = 2  # hardcodes the default Linear-ReLU-Linear MLP


# ----------------------------------------------------------------------------
# Pallas kernel: fused (weighted-feature) matmul + 2-layer MLP, transposed out
# ----------------------------------------------------------------------------
def _sdf_kernel(pf_ref, rgbt_ref, w1ft_ref, w1rt_ref, b1t_ref, w2t_ref, b2_ref,
                out_ref):
    # pf_ref   : (BN, K=320) bf16  pre-multiplied corner features, both streams
    # rgbt_ref : (3, BN)     f32   rgb, transposed (lane-dense)
    # w1ft_ref : (H, K)      bf16  W1 encoded rows, corner-tiled, transposed
    # w1rt_ref : (H, 3)      f32   W1 rgb rows, transposed
    # b1t_ref  : (H, 1)      f32
    # w2t_ref  : (1, H)      f32
    # b2_ref   : (1, 1)      f32   (SMEM scalar)
    # out_ref  : (1, BN)     f32   lane-dense output row
    #
    # z_T = W1f^T @ pf^T  -- NT dimension numbers (contract lane dims), the
    # standard flash-attention q@k^T pattern; corner reduction is inside this
    # contraction because W1f rows are tiled 8x over corners.
    z_t = lax.dot_general(
        w1ft_ref[...], pf_ref[...],
        (((1,), (1,)), ((), ())),
        preferred_element_type=jnp.float32)                       # (H, BN)
    z_t = z_t + jnp.dot(w1rt_ref[...], rgbt_ref[...],
                        preferred_element_type=jnp.float32)       # (H, BN)
    z_t = z_t + b1t_ref[...]                                      # + b1 (H,1)
    z_t = jnp.maximum(z_t, 0.0)                                   # ReLU

    out_ref[...] = (jnp.dot(w2t_ref[...], z_t,
                            preferred_element_type=jnp.float32)   # (1, BN)
                    + b2_ref[0, 0])


def _mlp_pallas(pf, rgbt, w1ft, w1rt, b1t, w2t, b2, *, block_n):
    npad, K = pf.shape            # K = 2 * 8 * n_levels
    H = w1ft.shape[0]
    grid = (npad // block_n,)
    # VMEM per step (double-buffered) at block_n=4096:
    #   features 2 x 4096*384(lane-pad)*2B ~= 6 MiB, rgbT/out ~0.5 MiB,
    #   z_T temp ~1 MiB, weights < 0.2 MiB  ->  well under the 32 MiB limit.
    return pl.pallas_call(
        _sdf_kernel,
        out_shape=jax.ShapeDtypeStruct((1, npad), jnp.float32),
        grid=grid,
        in_specs=[
            pl.BlockSpec((block_n, K), lambda i: (i, 0)),    # pf (bf16)
            pl.BlockSpec((3, block_n), lambda i: (0, i)),    # rgb^T (f32)
            pl.BlockSpec((H, K), lambda i: (0, 0)),          # W1f^T (bf16)
            pl.BlockSpec((H, 3), lambda i: (0, 0)),          # W1r^T (f32)
            pl.BlockSpec((H, 1), lambda i: (0, 0)),          # b1^T
            pl.BlockSpec((1, H), lambda i: (0, 0)),          # W2^T
            pl.BlockSpec(memory_space=pltpu.MemorySpace.SMEM),  # b2 scalar
        ],
        out_specs=pl.BlockSpec((1, block_n), lambda i: (0, i)),
        compiler_params=pltpu.CompilerParams(
            dimension_semantics=("parallel",),      # megacore sharding on v7x
            vmem_limit_bytes=32 * 1024 * 1024,
        ),
    )(pf, rgbt, w1ft, w1rt, b1t, w2t, b2)


# ----------------------------------------------------------------------------
# HashGrid encoding prep (hash + gather in JAX; weighting/reduction in-kernel)
# ----------------------------------------------------------------------------
# TODO(synk): the data-dependent hash-table gather itself stays in JAX; doing
# it in-kernel would need manual DMA gather from HBM.
def _hash_encode_corners(p, table, cfg):
    """Returns (f0, f1, w), each [N, 8*L] float32, corner-major layout
    (column index = corner*L + level)."""
    L = cfg["n_levels"]
    F = cfg["n_features_per_level"]
    base = cfg["base_resolution"]
    plscale = cfg["per_level_scale"]
    T = 2 ** cfg["log2_hashmap_size"]
    N = p.shape[0]
    assert F == 2

    offsets = jnp.array(
        [[(c >> d) & 1 for d in range(3)] for c in range(8)], dtype=jnp.int32
    )  # (8, 3)
    primes = jnp.array([1, 2654435761, 805459861], dtype=jnp.uint32)

    feats_levels, w_levels = [], []
    for lvl in range(L):
        scale = (2.0 ** (lvl * math.log2(plscale))) * base - 1.0
        res = int(math.ceil(scale)) + 1
        pos = p * scale + 0.5
        grid = jnp.floor(pos)
        frac = pos - grid
        grid = grid.astype(jnp.int32)

        corner = grid[:, None, :] + offsets[None, :, :]  # (N, 8, 3)

        if res ** 3 <= T:
            idx = (corner[..., 0]
                   + corner[..., 1] * res
                   + corner[..., 2] * (res * res))
            idx = jnp.clip(idx, 0, T - 1)
        else:
            ch = corner.astype(jnp.uint32) * primes
            idx = (ch[..., 0] ^ ch[..., 1] ^ ch[..., 2]) & jnp.uint32(T - 1)
            idx = idx.astype(jnp.int32)

        feats_levels.append(table[lvl][idx])  # (N, 8, F)

        wl = jnp.where(offsets[None, :, :] == 1,
                       frac[:, None, :], 1.0 - frac[:, None, :])  # (N, 8, 3)
        w_levels.append(jnp.prod(wl, axis=-1))                    # (N, 8)

    feats = jnp.stack(feats_levels, axis=2)          # (N, 8, L, F)
    w = jnp.stack(w_levels, axis=2)                  # (N, 8, L)
    f0 = feats[..., 0].reshape(N, 8 * L)             # corner-major
    f1 = feats[..., 1].reshape(N, 8 * L)
    w = w.reshape(N, 8 * L)
    return f0.astype(jnp.float32), f1.astype(jnp.float32), w.astype(jnp.float32)


# ----------------------------------------------------------------------------
# Parameter init (deterministic, mirrors shapes from SDFNet.__init__)
# ----------------------------------------------------------------------------
def init_params(key, cfg=HASH_CONFIG, hidden_dim=HIDDEN_DIM):
    L = cfg["n_levels"]
    F = cfg["n_features_per_level"]
    T = 2 ** cfg["log2_hashmap_size"]
    enc_dim = L * F
    in_dim = enc_dim + 3

    k_tab, k_w1, k_b1, k_w2, k_b2 = jax.random.split(key, 5)
    table = jax.random.uniform(k_tab, (L, T, F), jnp.float32, -1e-4, 1e-4)

    bnd1 = 1.0 / math.sqrt(in_dim)
    W1 = jax.random.uniform(k_w1, (in_dim, hidden_dim), jnp.float32, -bnd1, bnd1)
    b1 = jax.random.uniform(k_b1, (1, hidden_dim), jnp.float32, -bnd1, bnd1)
    bnd2 = 1.0 / math.sqrt(hidden_dim)
    W2 = jax.random.uniform(k_w2, (hidden_dim, 1), jnp.float32, -bnd2, bnd2)
    b2 = jax.random.uniform(k_b2, (1, 1), jnp.float32, -bnd2, bnd2)
    return {"table": table, "W1": W1, "b1": b1, "W2": W2, "b2": b2}


# ----------------------------------------------------------------------------
# Forward pass:  x [N, 6] -> sdf [N]
# ----------------------------------------------------------------------------
def sdfnet_forward(params, x, cfg=HASH_CONFIG, block_n=4096):
    L = cfg["n_levels"]
    F = cfg["n_features_per_level"]
    enc_dim = L * F

    p = x[:, :3]
    rgb = x[:, 3:].astype(jnp.float32)
    N = x.shape[0]

    f0, f1, w = _hash_encode_corners(p, params["table"], cfg)   # (N, 8L) f32

    # Pre-multiply the trilinear weights and fuse the two per-level feature
    # streams into a single bf16 operand (single HBM stream, single matmul).
    pf = jnp.concatenate([f0 * w, f1 * w], axis=1).astype(jnp.bfloat16)  # (N,16L)

    # rgb stays f32, transposed to a lane-dense (3, N) layout.
    rgbt = rgb.T                                                  # (3, N)

    # Block size: multiple of 128 lanes; keep >= 2 grid steps when possible so
    # megacore (v7x) can shard the 'parallel' axis across both TensorCores.
    n128 = pl.cdiv(N, 128) * 128
    half = max(128, ((n128 // 2) // 128) * 128)
    block_n = int(max(128, min(int(block_n), half)))
    npad = pl.cdiv(N, block_n) * block_n
    pad = npad - N
    if pad:
        pf = jnp.pad(pf, ((0, pad), (0, 0)))
        rgbt = jnp.pad(rgbt, ((0, 0), (0, pad)))

    # Fold the 8-corner reduction into W1: tile its encoded rows 8x over
    # corners, stack both feature streams, and transpose for the (H,K)@(BN,K)^T
    # contraction:  sum_c (f_c * w_c) @ W1e  ==  concat_c(f_c * w_c) @ tile(W1e).
    W1 = params["W1"]
    W1e = W1[:enc_dim]                                   # (L*F, H)
    W1r = W1[enc_dim:]                                   # (3, H)
    W10 = jnp.tile(W1e[0::F], (8, 1))                    # (8L, H)  feature 0
    W11 = jnp.tile(W1e[1::F], (8, 1))                    # (8L, H)  feature 1
    W1fT = jnp.concatenate([W10, W11], axis=0).T.astype(jnp.bfloat16)  # (H, 16L)
    W1rT = W1r.T                                         # (H, 3) f32
    b1T = params["b1"].T                                 # (H, 1) f32
    W2T = params["W2"].T                                 # (1, H) f32

    out = _mlp_pallas(pf, rgbt, W1fT, W1rT, b1T, W2T, params["b2"],
                      block_n=block_n)                   # (1, npad)
    return out[0, :N]


# ----------------------------------------------------------------------------
# Pure-JAX f32 reference (module semantics)
# ----------------------------------------------------------------------------
def _forward_reference(params, x, cfg=HASH_CONFIG):
    L = cfg["n_levels"]
    F = cfg["n_features_per_level"]
    N = x.shape[0]
    p = x[:, :3]
    rgb = x[:, 3:]
    f0, f1, w = _hash_encode_corners(p, params["table"], cfg)
    f0 = f0.reshape(N, 8, L)
    f1 = f1.reshape(N, 8, L)
    w = w.reshape(N, 8, L)
    enc0 = jnp.sum(f0 * w, axis=1)                       # (N, L)
    enc1 = jnp.sum(f1 * w, axis=1)                       # (N, L)
    enc = jnp.stack([enc0, enc1], axis=-1).reshape(N, L * F)  # l0f0,l0f1,l1f0,...
    h = jnp.concatenate([enc, rgb], axis=-1)
    z = jnp.maximum(h @ params["W1"] + params["b1"], 0.0)
    return (z @ params["W2"] + params["b2"])[:, 0]


if __name__ == "__main__":
    key = jax.random.PRNGKey(0)
    k_param, k_xyz, k_rgb = jax.random.split(key, 3)

    params = init_params(k_param)

    N = 256
    xyz = jax.random.uniform(k_xyz, (N, 3), jnp.float32)   # points in [0,1]^3
    rgb = jax.random.uniform(k_rgb, (N, 3), jnp.float32)
    x = jnp.concatenate([xyz, rgb], axis=-1)                # [N, 6]

    sdf = jax.block_until_ready(sdfnet_forward(params, x))
    ref = jax.block_until_ready(_forward_reference(params, x))

    assert sdf.shape == (N,)
    # bf16 compression of the (tiny-magnitude) weighted features => relaxed tol
    assert jnp.allclose(sdf, ref, atol=2e-4, rtol=2e-3), "mismatch vs JAX reference"

    print("KERNEL_OK")
</pallas_src>

<mosaic_0001>
module attributes {stable_mosaic.version = 11 : i64} {
  func.func @_sdf_kernel(%arg0: i32, %arg1: memref<128x320xbf16, #tpu.memory_space<vmem>>, %arg2: memref<3x128xf32, #tpu.memory_space<vmem>>, %arg3: memref<64x320xbf16, #tpu.memory_space<vmem>>, %arg4: memref<64x3xf32, #tpu.memory_space<vmem>>, %arg5: memref<64x1xf32, #tpu.memory_space<vmem>>, %arg6: memref<1x64xf32, #tpu.memory_space<vmem>>, %arg7: memref<1x1xf32, #tpu.memory_space<smem>>, %arg8: memref<1x128xf32, #tpu.memory_space<vmem>>) attributes {dimension_semantics = [#tpu.dimension_semantics<parallel>], iteration_bounds = array<i64: 2>, scalar_prefetch = 0 : i64, scratch_operands = 0 : i64, tpu.core_type = #tpu.core_type<tc>, window_params = [{transform_indices = @transform_0, window_bounds = array<i64: 128, 320>}, {transform_indices = @transform_1, window_bounds = array<i64: 3, 128>}, {pipeline_mode = #tpu.pipeline_mode<synchronous>, transform_indices = @transform_2, window_bounds = array<i64: 64, 320>}, {pipeline_mode = #tpu.pipeline_mode<synchronous>, transform_indices = @transform_3, window_bounds = array<i64: 64, 3>}, {pipeline_mode = #tpu.pipeline_mode<synchronous>, transform_indices = @transform_4, window_bounds = array<i64: 64, 1>}, {pipeline_mode = #tpu.pipeline_mode<synchronous>, transform_indices = @transform_5, window_bounds = array<i64: 1, 64>}, {transform_indices = @transform_6, window_bounds = array<i64: 1, 1>}, {transform_indices = @transform_7, window_bounds = array<i64: 1, 128>}]} {
    %c0 = arith.constant 0 : index
    %c0_0 = arith.constant 0 : index
    %0 = vector.load %arg3[%c0, %c0_0] : memref<64x320xbf16, #tpu.memory_space<vmem>>, vector<64x320xbf16>
    %c0_1 = arith.constant 0 : index
    %c0_2 = arith.constant 0 : index
    %1 = vector.load %arg1[%c0_1, %c0_2] : memref<128x320xbf16, #tpu.memory_space<vmem>>, vector<128x320xbf16>
    %cst = arith.constant dense<0.000000e+00> : vector<64x128xf32>
    %2 = tpu.matmul %0, %1, %cst {dimension_numbers = #tpu.dot_dimension_numbers<[1], [1], [0], [0], [0, 0, 1, 0], [], []>} : vector<64x320xbf16>, vector<128x320xbf16>, vector<64x128xf32> -> vector<64x128xf32>
    %c0_3 = arith.constant 0 : index
    %c0_4 = arith.constant 0 : index
    %3 = vector.load %arg4[%c0_3, %c0_4] : memref<64x3xf32, #tpu.memory_space<vmem>>, vector<64x3xf32>
    %c0_5 = arith.constant 0 : index
    %c0_6 = arith.constant 0 : index
    %4 = vector.load %arg2[%c0_5, %c0_6] : memref<3x128xf32, #tpu.memory_space<vmem>>, vector<3x128xf32>
    %cst_7 = arith.constant dense<0.000000e+00> : vector<64x128xf32>
    %5 = tpu.matmul %3, %4, %cst_7 {dimension_numbers = #tpu.dot_dimension_numbers<[1], [0], [0], [1], [0, 0, 1, 1], [], []>} : vector<64x3xf32>, vector<3x128xf32>, vector<64x128xf32> -> vector<64x128xf32>
    %6 = arith.addf %2, %5 : vector<64x128xf32>
    %c0_8 = arith.constant 0 : index
    %c0_9 = arith.constant 0 : index
    %7 = vector.load %arg5[%c0_8, %c0_9] : memref<64x1xf32, #tpu.memory_space<vmem>>, vector<64x1xf32>
    %8 = vector.broadcast %7 : vector<64x1xf32> to vector<64x128xf32>
    %9 = arith.addf %6, %8 : vector<64x128xf32>
    %cst_10 = arith.constant 0.000000e+00 : f32
    %10 = vector.broadcast %cst_10 : f32 to vector<64x128xf32>
    %11 = arith.maximumf %9, %10 : vector<64x128xf32>
    %c0_11 = arith.constant 0 : index
    %c0_12 = arith.constant 0 : index
    %12 = vector.load %arg6[%c0_11, %c0_12] : memref<1x64xf32, #tpu.memory_space<vmem>>, vector<1x64xf32>
    %cst_13 = arith.constant dense<0.000000e+00> : vector<1x128xf32>
    %13 = tpu.matmul %12, %11, %cst_13 {dimension_numbers = #tpu.dot_dimension_numbers<[1], [0], [0], [1], [0, 0, 1, 1], [], []>} : vector<1x64xf32>, vector<64x128xf32>, vector<1x128xf32> -> vector<1x128xf32>
    %c0_14 = arith.constant 0 : index
    %c0_15 = arith.constant 0 : index
    %14 = memref.load %arg7[%c0_14, %c0_15] : memref<1x1xf32, #tpu.memory_space<smem>>
    %15 = vector.broadcast %14 : f32 to vector<1x128xf32>
    %16 = arith.addf %13, %15 : vector<1x128xf32>
    %c0_16 = arith.constant 0 : index
    %c0_17 = arith.constant 0 : index
    %17 = vector.load %arg8[%c0_16, %c0_17] : memref<1x128xf32, #tpu.memory_space<vmem>>, vector<1x128xf32>
    tpu.vector_store %arg8[%c0_16, %c0_17], %16 {strides = array<i32>} : memref<1x128xf32, #tpu.memory_space<vmem>>, vector<1x128xf32>,
    return
  }
  func.func @transform_0(%arg0: i32) -> (i32, i32) {
    %c0_i32 = arith.constant 0 : i32
    %c0_i32_0 = arith.constant 0 : i32
    return %arg0, %c0_i32 : i32, i32
  }
  func.func @transform_1(%arg0: i32) -> (i32, i32) {
    %c0_i32 = arith.constant 0 : i32
    %c0_i32_0 = arith.constant 0 : i32
    return %c0_i32, %arg0 : i32, i32
  }
  func.func @transform_2(%arg0: i32) -> (i32, i32) {
    %c0_i32 = arith.constant 0 : i32
    %c0_i32_0 = arith.constant 0 : i32
    %c0_i32_1 = arith.constant 0 : i32
    return %c0_i32, %c0_i32_0 : i32, i32
  }
  func.func @transform_3(%arg0: i32) -> (i32, i32) {
    %c0_i32 = arith.constant 0 : i32
    %c0_i32_0 = arith.constant 0 : i32
    %c0_i32_1 = arith.constant 0 : i32
    return %c0_i32, %c0_i32_0 : i32, i32
  }
  func.func @transform_4(%arg0: i32) -> (i32, i32) {
    %c0_i32 = arith.constant 0 : i32
    %c0_i32_0 = arith.constant 0 : i32
    %c0_i32_1 = arith.constant 0 : i32
    return %c0_i32, %c0_i32_0 : i32, i32
  }
  func.func @transform_5(%arg0: i32) -> (i32, i32) {
    %c0_i32 = arith.constant 0 : i32
    %c0_i32_0 = arith.constant 0 : i32
    %c0_i32_1 = arith.constant 0 : i32
    return %c0_i32, %c0_i32_0 : i32, i32
  }
  func.func @transform_6(%arg0: i32) -> (i32, i32) {
    %c0_i32 = arith.constant 0 : i32
    %c0_i32_0 = arith.constant 0 : i32
    %c0_i32_1 = arith.constant 0 : i32
    return %c0_i32, %c0_i32_0 : i32, i32
  }
  func.func @transform_7(%arg0: i32) -> (i32, i32) {
    %c0_i32 = arith.constant 0 : i32
    %c0_i32_0 = arith.constant 0 : i32
    return %c0_i32, %arg0 : i32, i32
  }
}

</mosaic_0001>

<bundles_post_ra>
// kernel: tpu_custom_call.1
= control target key start
LH: loop header
LB: loop body
LE: loop exit
PB: predicated region body
PF: predicated region fallthrough
CT: control target
= control target key end

     0   :  { %s1683_s0 = inlined_call_operand.vmem [shape: bf16[256,320], index: 0, kind: input, shape index: {}]   ;;  %s1684_s1 = inlined_call_operand.vmem [shape: f32[3,256], index: 1, kind: input, shape index: {}]   ;;  %s1685_s2 = inlined_call_operand.vmem [shape: bf16[64,320], index: 2, kind: input, shape index: {}]   ;;  %s1686_s3 = inlined_call_operand.vmem [shape: f32[64,3], index: 3, kind: input, shape index: {}]   ;;  %s1687_s4 = inlined_call_operand.vmem [shape: f32[64,1], index: 4, kind: input, shape index: {}]   ;;  %s1688_s5 = inlined_call_operand.vmem [shape: f32[1,64], index: 5, kind: input, shape index: {}]   ;;  %s1689_s6 = inlined_call_operand.<no memory space> [shape: f32[1,1], index: 6, kind: input, shape index: {}]   ;;  %s1690_s7 = inlined_call_operand.hbm [shape: f32[1,256], index: 7, kind: output, shape index: {}]  }
   0x1   :  { %12 = sst [smem:[#allocation2]] %s1689_s6 }
   0x2   :  { %13 = vsyncpa [#allocation4], 0 }
   0x3   :  { %15 = vsyncpa [#allocation4 + $0x1], 0  ;;  %s1432_s26 = smov 0   ;;  %s1434_s27 = smov 0  }
   0x4   :  { %s1436_s28 = smov 0   ;;  %s1438_s29 = smov 0  }
   0x5 LB: > { %s1058_s6 = sadd.s32 4294967295, %s1382_s29   ;;  %s1059_s30 = sadd.s32 4294967294, %s1382_s29   ;;  %s1382_s29 = sphi %s1438_s29, %s1696_s29   ;;  %s1378_s28 = sphi %s1436_s28, %s1695_s28   ;;  %s1374_s27 = sphi %s1434_s27, %s1694_s27   ;;  %s1370_s26 = sphi %s1432_s26, %s1693_s26  }
   0x6   : > { %s1455_s8 = sadd.s32 1, %s1382_s29   ;;  %s185_s9 = sadd.s32 1, %s1378_s28 }
   0x7   : > { %s182_s10 = ssub.s32 %s1382_s29, %s1455_s8  ;;  %p195_p0 = scmp.ne.s32.totalorder %s1378_s28, %s1374_s27 }
   0x8   : > { %p183_p1 = scmp.eq.s32.totalorder %s182_s10, 0  ;;  %p196_p2 = scmp.eq.s32.totalorder %s1058_s6, 1 }
   0x9   : > { %p201_p3 = scmp.ne.s32.totalorder %s1374_s27, %s1370_s26  ;;  %p202_p4 = scmp.eq.s32.totalorder %s1059_s30, 1 }
   0xa   : > { %s1465_s11 = scalar_select %p183_p1, %s1378_s28, %s185_s9  }
   0xb   : > { %p1467_p5 = por %p196_p2, %p195_p0  ;;  %p1471_p6 = por %p202_p4, %p201_p3 }
   0xc   : > { %p1062_p7 = scmp.ge.s32.totalorder %s1382_s29, 1  ;;  %p252_p8 = scmp.lt.s32.totalorder %s1382_s29, 3 }
   0xe   : > { %p253_p9 = pnand %p1062_p7, %p252_p8 }
   0xf   : > { %p295_p10 = scmp.lt.s32.totalorder (!%p253_p9), %s1058_s6, 1  ;;  %s1477_s14 = sshll.u32 (!%p253_p9), %s1058_s6, 4  ;;  %v348_v0 = vld [vmem:[%s1686_s3] sm:$0xff] (!%p253_p9)  ;;  %vm357_vm0 = vcmask (!%p253_p9), 23552   ;;  %v1384_v1 = vmov (!%p253_p9), 0   ;;  %vm382_vm1 = vcmask (!%p253_p9), 1042432  }
  0x10   : > { %256 = sbr.rel (%p253_p9) target bundleno = 573 (0x23d), region = 48  ;;  %p289_p11 = scmp.lt.s32.totalorder (!%p253_p9), %s1477_s14, 31  ;;  %1151 = vmatprep.mubr.msk.f32.mxu0 (!%p253_p9), %vm357_vm0, %v348_v0  ;;  %1270 = vset.pattern.permute.xlu0 (!%p253_p9), %v1384_v1  ;;  %v1306_v2 = vld [vmem:[%s1685_s2 + $0x4] ss:$12 sps:$4 sm:$0xff] (!%p253_p9)   ;;  %v349_v4 = vld [vmem:[%s1686_s3 + $0x8] sm:$0xff] (!%p253_p9)  ;;  %vm671_vm2 = vcmask (!%p253_p9), 523264  }
  0x11   : > { %1271 = vset.pattern.permute.xlu1 (!%p253_p9), %v1384_v1  ;;  %740 = vmatprep.mubr.bf16.mxu1 (!%p253_p9), %v1306_v2  ;;  %v350_v5 = vld [vmem:[%s1686_s3 + $0x10] sm:$0xff] (!%p253_p9)  ;;  %v351_v7 = vld [vmem:[%s1686_s3 + $0x18] sm:$0xff] (!%p253_p9)  ;;  %v352_v11 = vld [vmem:[%s1686_s3 + $0x20] sm:$0xff] (!%p253_p9)  ;;  %v1385_v62 = vmov (!%p253_p9), 0.0|0.0   ;;  %vm1386_vm3 = vmmov (!%p253_p9), 0   ;;  %v1387_v63 = vmov (!%p253_p9), 0.0   ;;  %s1641_s15 = scalar_lea.hbm (!%p253_p9), %s1690_s7, %s1477_s14 }
  0x12   : > { %v353_v14 = vld [vmem:[%s1686_s3 + $0x28] sm:$0xff] (!%p253_p9)  ;;  %v354_v16 = vld [vmem:[%s1686_s3 + $0x30] sm:$0xff] (!%p253_p9)  ;;  %v355_v18 = vld [vmem:[%s1686_s3 + $0x38] sm:$0xff] (!%p253_p9) }
  0x13   : > { %v1307_v19 = vld [vmem:[%s1685_s2 + $0x8] ss:$12 sps:$4 sm:$0xff] (!%p253_p9)   ;;  %v838_v27 = vld [vmem:[%s1687_s4] sm:$0xff] (!%p253_p9)  ;;  %v841_v31 = vld [vmem:[%s1687_s4 + $0x18] sm:$0xff] (!%p253_p9) }
  0x14   : > { %848 = vperm.xlu0 (!%p253_p9), %1270, %v838_v27   ;;  %v840_v29 = vld [vmem:[%s1687_s4 + $0x10] sm:$0xff] (!%p253_p9)  ;;  %v839_v30 = vld [vmem:[%s1687_s4 + $0x8] sm:$0xff] (!%p253_p9)  ;;  %v842_v34 = vld [vmem:[%s1687_s4 + $0x20] sm:$0xff] (!%p253_p9) }
  0x15   : > { %858 = vperm.xlu1 (!%p253_p9), %1271, %v840_v29   ;;  %v843_v35 = vld [vmem:[%s1687_s4 + $0x28] sm:$0xff] (!%p253_p9)  ;;  %v844_v38 = vld [vmem:[%s1687_s4 + $0x30] sm:$0xff] (!%p253_p9)  ;;  %v845_v39 = vld [vmem:[%s1687_s4 + $0x38] sm:$0xff] (!%p253_p9) }
  0x16   : > { %v1304_v52 = vld [vmem:[%s1685_s2] ss:$12 sps:$4 sm:$0xff] (!%p253_p9)   ;;  %v1309_v53 = vld [vmem:[%s1685_s2 + $0x1c] ss:$12 sps:$4 sm:$0xff] (!%p253_p9)   ;;  %v1315_v55 = vld [vmem:[%s1685_s2 + $0x38] ss:$12 sps:$4 sm:$0xff] (!%p253_p9)  }
  0x17   : > { %s1698_s6 = smov (!%p295_p10, %s1058_s6), 1  ;;  %v1308_v54 = vld [vmem:[%s1685_s2 + $0x20] ss:$12 sps:$4 sm:$0xff]   ;;  %v1311_v56 = vld [vmem:[%s1685_s2 + $0x18] ss:$12 sps:$4 sm:$0xff]  }
  0x18   : > { %s290_s17 = scalar_select %p289_p11, %s1477_s14, 31  ;;  %853 = vperm.xlu0 %1270, %v839_v30   ;;  %v1312_v57 = vld [vmem:[%s1685_s2 + $0x34] ss:$12 sps:$4 sm:$0xff]   ;;  %v1316_v58 = vld [vmem:[%s1685_s2 + $0x50] ss:$12 sps:$4 sm:$0xff]  }
  0x19   : > { %s1065_s18 = sshll.u32 %s1698_s6, 2  ;;  %863 = vperm.xlu1 %1271, %v841_v31   ;;  %v1314_v59 = vld [vmem:[%s1685_s2 + $0x30] ss:$12 sps:$4 sm:$0xff]   ;;  %v1317_v60 = vld [vmem:[%s1685_s2 + $0x4c] ss:$12 sps:$4 sm:$0xff]  }
  0x1a   : > { %s298_s23 = scalar_lea.vmem %s1684_s1, %s1065_s18  ;;  %s1226_s24 = smul.u32 12, %s290_s17  ;;  %v1319_v61 = vld [vmem:[%s1685_s2 + $0x48] ss:$12 sps:$4 sm:$0xff]  }
  0x1b   : > { %v356_v3 = vld [vmem:[%s298_s23] sm:$0x7]  ;;  %s903_s23 = sld [smem:[#allocation2]]  ;;  %s1388_s18 = smov [#allocation3]  }
  0x1c   : > { %1149 = vmatprep.subr.msk.mxu0 %vm382_vm1, %v356_v3  ;;  %s1497_s6 = scalar_lea.vmem %s1683_s0, %s1226_s24  ;;  %868 = vperm.xlu0 %1270, %v842_v34   ;;  %s286_s24 = sand.u32 1, %s1374_s27  }
  0x1d   : > { %1150 = vmatpush3.msk.msra.mxu0 %vm382_vm1, %v356_v3  ;;  %v1272_v6 = vld [vmem:[%s1497_s6 + $0x4] ss:$12 sps:$4 sm:$0xff]   ;;  %v1274_v8 = vld [vmem:[%s1497_s6] ss:$12 sps:$4 sm:$0xff]   ;;  %v1275_v9 = vld [vmem:[%s1497_s6 + $0x8] ss:$12 sps:$4 sm:$0xff]   ;;  %873 = vperm.xlu1 %1271, %v843_v35  }
  0x1e   : > { %1152 = vmatmul.mubr.msk.f32.vlgmr.msra.gmra.mrb[0].mxu0 %vm357_vm0, %v349_v4  ;;  %708 = vmatprep.subr.bf16.mxu1 %v1272_v6  ;;  %v1276_v10 = vld [vmem:[%s1497_s6 + $0x1c] ss:$12 sps:$4 sm:$0xff]   ;;  %v685_v12 = vsel %vm671_vm2, %v1275_v9, 0  ;;  %v1279_v13 = vld [vmem:[%s1497_s6 + $0x20] ss:$12 sps:$4 sm:$0xff]   ;;  %s287_s25 = scalar_lea.vmem [#allocation3], %s286_s24 }
  0x1f   : > { %1154 = vmatprep.mubr.msk.f32.mxu0 %vm357_vm0, %v350_v5  ;;  %709 = vmatpush1.bf16.xpose.msra.mxu1 %v1274_v8  ;;  %v1278_v15 = vld [vmem:[%s1497_s6 + $0x18] ss:$12 sps:$4 sm:$0xff]   ;;  %v1280_v17 = vld [vmem:[%s1497_s6 + $0x34] ss:$12 sps:$4 sm:$0xff]   ;;  %v688_v20 = vsel %vm671_vm2, %v1279_v13, 0  ;;  %s992_s30 = sshll.u32 %s287_s25, 4  ;;  %s1643_s30 = int_to_ptr.vmem [resolvable:$true] %s992_s30 }
  0x20   : > { %1218 = vmatprep.subr.msk.bf16.mxu0 %vm671_vm2, %v1275_v9  ;;  %710 = vmatprep.subr.bf16.mxu1 %v1276_v10  ;;  %v1283_v21 = vld [vmem:[%s1497_s6 + $0x38] ss:$12 sps:$4 sm:$0xff]   ;;  %v1282_v22 = vld [vmem:[%s1497_s6 + $0x30] ss:$12 sps:$4 sm:$0xff]   ;;  %v1286_v26 = vld [vmem:[%s1497_s6 + $0x48] ss:$12 sps:$4 sm:$0xff]  }
  0x21   : > { %v1284_v23 = vld [vmem:[%s1497_s6 + $0x4c] ss:$12 sps:$4 sm:$0xff]   ;;  %v691_v24 = vsel %vm671_vm2, %v1283_v21, 0  ;;  %v1287_v25 = vld [vmem:[%s1497_s6 + $0x50] ss:$12 sps:$4 sm:$0xff]   ;;  %878 = vperm.xlu0 %1270, %v844_v38   ;;  %883 = vperm.xlu1 %1271, %v845_v39   ;;  %s980_s16 = scalar_lea.sflag [#allocation4], %s286_s24 }
  0x22   : > { %1155 = vmatmul.mubr.msk.f32.gmra.mrb[2].mxu0 %vm357_vm0, %v351_v7  ;;  %v1288_v28 = vld [vmem:[%s1497_s6 + $0x64] ss:$12 sps:$4 sm:$0xff]   ;;  %v694_v32 = vsel %vm671_vm2, %v1287_v25, 0  ;;  %v1291_v33 = vld [vmem:[%s1497_s6 + $0x68] ss:$12 sps:$4 sm:$0xff]   ;;  %s1320_s17 = scalar_lea.vmem %s1643_s30, 16 }
  0x23   : > { %1157 = vmatprep.mubr.msk.f32.mxu0 %vm357_vm0, %v352_v11  ;;  %v1290_v36 = vld [vmem:[%s1497_s6 + $0x60] ss:$12 sps:$4 sm:$0xff]   ;;  %v1292_v37 = vld [vmem:[%s1497_s6 + $0x7c] ss:$12 sps:$4 sm:$0xff]   ;;  %v697_v40 = vsel %vm671_vm2, %v1291_v33, 0  ;;  %p1321_p12 = scmp.ne.s32.totalorder %s1643_s30, %s1320_s17  ;;  %s1324_s19 = sshll.u32 %s1388_s18, 4  ;;  %s1325_s19 = int_to_ptr.vmem [resolvable:$false] %s1324_s19 }
  0x24   : > { %1164 = vmatpush3.bf16.xpose.msra.mxu0 %v685_v12  ;;  %v1295_v41 = vld [vmem:[%s1497_s6 + $0x80] ss:$12 sps:$4 sm:$0xff]   ;;  %v1294_v42 = vld [vmem:[%s1497_s6 + $0x78] ss:$12 sps:$4 sm:$0xff]   ;;  %v1298_v46 = vld [vmem:[%s1497_s6 + $0x90] ss:$12 sps:$4 sm:$0xff]   ;;  %p1327_p1 = scmp.lt.s32.totalorder %s1643_s30, %s1325_s19 }
  0x25   : > { %1219 = vmatprep.subr.msk.bf16.mxu0 %vm671_vm2, %v1279_v13  ;;  %v1296_v43 = vld [vmem:[%s1497_s6 + $0x94] ss:$12 sps:$4 sm:$0xff]   ;;  %v700_v44 = vsel %vm671_vm2, %v1295_v41, 0  ;;  %v1299_v45 = vld [vmem:[%s1497_s6 + $0x98] ss:$12 sps:$4 sm:$0xff]   ;;  %p1322_p13 = pnand %p1321_p12, %p1467_p5  ;;  %s1326_s20 = scalar_lea.vmem %s1325_s19, 32 }
  0x26   : > { %1158 = vmatmul.mubr.msk.f32.gmra.mrb[4].mxu0 %vm357_vm0, %v353_v14  ;;  %v1300_v47 = vld [vmem:[%s1497_s6 + $0xac] ss:$12 sps:$4 sm:$0xff]   ;;  %v703_v48 = vsel %vm671_vm2, %v1299_v45, 0  ;;  %v1303_v49 = vld [vmem:[%s1497_s6 + $0xb0] ss:$12 sps:$4 sm:$0xff]   ;;  %p1328_p2 = scmp.lt.s32.totalorder %s1326_s20, %s1320_s17 }
  0x27   : > { %1160 = vmatprep.mubr.msk.f32.mxu0 %vm357_vm0, %v354_v16  ;;  %711 = vmatpush1.bf16.xpose.msra.mxu1 %v1278_v15  ;;  %v1302_v50 = vld [vmem:[%s1497_s6 + $0xa8] ss:$12 sps:$4 sm:$0xff]   ;;  %v706_v51 = vsel %vm671_vm2, %v1303_v49, 0  ;;  %p1323_p0 = pneg %p1322_p13 }
  0x28   : > { %712 = vmatprep.subr.bf16.mxu1 %v1280_v17  ;;  %p1329_p3 = por %p1328_p2, %p1327_p1 }
  0x2a   : > { %1161 = vmatmul.mubr.msk.f32.gmra.mrb[6].mxu0 %vm357_vm0, %v355_v18  ;;  %p1330_p4 = pnand %p1329_p3, %p1323_p0 }
  0x2b   : > { %1179 = vmatprep.mubr.msk.bf16.mxu0 %vm671_vm2, %v1307_v19 }
  0x2c   : > { %1166 = vmatpush3.bf16.xpose.msra.mxu0 %v688_v20 }
  0x2d   : > { %1220 = vmatprep.subr.msk.bf16.mxu0 %vm671_vm2, %v1283_v21 }
  0x2f   : > { %713 = vmatpush1.bf16.xpose.msra.mxu1 %v1282_v22 }
  0x30   : > { %714 = vmatprep.subr.bf16.mxu1 %v1284_v23 }
  0x34   : > { %1168 = vmatpush3.bf16.xpose.msra.mxu0 %v691_v24 }
  0x35   : > { %1221 = vmatprep.subr.msk.bf16.mxu0 %vm671_vm2, %v1287_v25 }
  0x37   : > { %715 = vmatpush1.bf16.xpose.msra.mxu1 %v1286_v26 }
  0x38   : > { %716 = vmatprep.subr.bf16.mxu1 %v1288_v28 }
  0x3c   : > { %1170 = vmatpush3.bf16.xpose.msra.mxu0 %v694_v32 }
  0x3d   : > { %1222 = vmatprep.subr.msk.bf16.mxu0 %vm671_vm2, %v1291_v33 }
  0x3f   : > { %717 = vmatpush1.bf16.xpose.msra.mxu1 %v1290_v36 }
  0x40   : > { %718 = vmatprep.subr.bf16.mxu1 %v1292_v37 }
  0x44   : > { %1172 = vmatpush3.bf16.xpose.msra.mxu0 %v697_v40 }
  0x45   : > { %1223 = vmatprep.subr.msk.bf16.mxu0 %vm671_vm2, %v1295_v41 }
  0x47   : > { %719 = vmatpush1.bf16.xpose.msra.mxu1 %v1294_v42 }
  0x48   : > { %720 = vmatprep.subr.bf16.mxu1 %v1296_v43 }
  0x4c   : > { %1174 = vmatpush3.bf16.xpose.msra.mxu0 %v700_v44 }
  0x4d   : > { %1224 = vmatprep.subr.msk.bf16.mxu0 %vm671_vm2, %v1299_v45 }
  0x4f   : > { %721 = vmatpush1.bf16.xpose.msra.mxu1 %v1298_v46 }
  0x50   : > { %722 = vmatprep.subr.bf16.mxu1 %v1300_v47 }
  0x54   : > { %1176 = vmatpush3.bf16.xpose.msra.mxu0 %v703_v48 }
  0x55   : > { %1225 = vmatprep.subr.msk.bf16.mxu0 %vm671_vm2, %v1303_v49 }
  0x57   : > { %723 = vmatpush1.bf16.xpose.msra.mxu1 %v1302_v50 }
  0x5c   : > { %1178 = vmatpush3.bf16.xpose.msra.mxu0 %v706_v51 }
  0x5d   : > { %1206 = vmatprep.subr.bf16.mxu0 %v1385_v62 }
  0x5e   : > { %741 = vmatmul.mubr.bf16.vlgmr.msra.gmra.mrb[0].mxu1 %v1304_v52 }
  0x5f   : > { %748 = vmatprep.mubr.bf16.mxu1 %v1309_v53 }
  0x63   : > { %1180 = vmatmul.mubr.msk.bf16.vlgmr.msra.gmra.mrb[8].mxu0 %vm671_vm2, %v1308_v54 }
  0x64   : > { %1183 = vmatprep.mubr.msk.bf16.mxu0 %vm671_vm2, %v1315_v55 }
  0x66   : > { %749 = vmatmul.mubr.bf16.gmra.mrb[4].mxu1 %v1311_v56 }
  0x67   : > { %756 = vmatprep.mubr.bf16.mxu1 %v1312_v57 }
  0x6b   : > { %1184 = vmatmul.mubr.msk.bf16.gmra.mrb[12].mxu0 %vm671_vm2, %v1316_v58 }
  0x6c   : > { %1203 = vmatprep.mubr.msk.f32.mxu0 %vm1386_vm3, %v1387_v63 }
  0x6e   : > { %757 = vmatmul.mubr.bf16.gmra.mrb[8].mxu1 %v1314_v59 }
  0x6f   : > { %764 = vmatprep.mubr.bf16.mxu1 %v1317_v60 }
  0x76   : > { %765 = vmatmul.mubr.bf16.gmra.mrb[12].mxu1 %v1319_v61 }
  0x93   : > { %v849_v12 = vpop.permute.xlu0 %848 }
  0x94   : > { %v859_v21 = vpop.permute.xlu1 %858 }
  0x97   : > { %v854_v24 = vpop.permute.xlu0 %853 }
  0x98   : > { %v864_v39 = vpop.permute.xlu1 %863 }
  0x9b   : > { %v869_v53 = vpop.permute.xlu0 %868 }
  0x9c   : > { %v874_v56 = vpop.permute.xlu1 %873 }
  0xf1   : > { %v1153_v0 = vpop.f32.mrb[0].mxu0 }
  0xf2   : > { %v452_v1 = vpop.f32.mrb[1].mxu0 }
  0xf5   : > { %v1156_v2 = vpop.f32.mrb[2].mxu0 }
  0xf6   : > { %v462_v3 = vpop.f32.mrb[3].mxu0 }
  0xf9   : > { %v1159_v4 = vpop.f32.mrb[4].mxu0 }
  0xfa   : > { %v472_v5 = vpop.f32.mrb[5].mxu0 }
  0xfd   : > { %v1626_v6 = vpop.f32.mrb[6].mxu0 }
  0xfe   : > { %v482_v7 = vpop.f32.mrb[7].mxu0 }
 0x131   : > { %v742_v8 = vpop.f32.mrb[0].mxu1 }
 0x132   : > { %v743_v9 = vadd.f32 %v742_v8, %v452_v1  ;;  %v744_v10 = vpop.f32.mrb[1].mxu1 }
 0x133   : > { %v745_v11 = vpop.f32.mrb[2].mxu1  ;;  %v884_v10 = vpop.permute.xlu1 %883 }
 0x134   : > { %v746_v13 = vadd.f32 %v1153_v0, %v745_v11  ;;  %v747_v14 = vpop.f32.mrb[3].mxu1 }
 0x135   : > { %v902_v14 = vld [vmem:[%s1688_s5] sm:$0x1] }
 0x136   : > { %v1181_v15 = vpop.f32.mrb[8].mxu0 }
 0x137   : > { %v807_v16 = vpop.f32.mrb[9].mxu0 }
 0x138   : > { %v808_v17 = vadd.f32 %v807_v16, %v743_v9  ;;  %v1182_v18 = vpop.f32.mrb[10].mxu0 }
 0x139   : > { %v810_v19 = vpop.f32.mrb[11].mxu0  ;;  %v750_v23 = vpop.f32.mrb[4].mxu1 }
 0x13a   : > { %v886_v20 = vadd.f32 %v849_v12, %v808_v17  ;;  %v811_v22 = vadd.f32 %v810_v19, %v746_v13  ;;  %v751_v25 = vadd.f32 %v750_v23, %v462_v3  ;;  %v752_v26 = vpop.f32.mrb[5].mxu1 }
 0x13b   : > { %v753_v28 = vpop.f32.mrb[6].mxu1 }
 0x13c   : > { %v887_v27 = vadd.f32 %v854_v24, %v811_v22  ;;  %v816_v29 = vadd.f32 %v1181_v15, %v751_v25  ;;  %v754_v30 = vadd.f32 %v1156_v2, %v753_v28  ;;  %v755_v31 = vpop.f32.mrb[7].mxu1  ;;  %v894_v32 = vmax.f32 %v886_v20, 0.0 }
 0x13e   : > { %v895_v33 = vmax.f32 %v887_v27, 0.0  ;;  %v1185_v34 = vpop.f32.mrb[12].mxu0  ;;  %v888_v35 = vadd.f32 %v859_v21, %v816_v29  ;;  %v819_v36 = vadd.f32 %v1182_v18, %v754_v30 }
 0x13f   : > { %v823_v37 = vpop.f32.mrb[13].mxu0 }
 0x140   : > { %v1207_v38 = vpack.c.bf16 %v895_v33, %v894_v32  ;;  %v1186_v40 = vpop.f32.mrb[14].mxu0  ;;  %v889_v41 = vadd.f32 %v864_v39, %v819_v36  ;;  %v896_v44 = vmax.f32 %v888_v35, 0.0 }
 0x141   : > { %v826_v42 = vpop.f32.mrb[15].mxu0  ;;  %v758_v43 = vpop.f32.mrb[8].mxu1 }
 0x142   : > { %1208 = vmatpush3.bf16.msra.mxu0 %v1207_v38  ;;  %v897_v45 = vmax.f32 %v889_v41, 0.0  ;;  %v759_v46 = vadd.f32 %v758_v43, %v472_v5  ;;  %v760_v47 = vpop.f32.mrb[9].mxu1  ;;  %v879_v5 = vpop.permute.xlu0 %878 }
 0x143   : > { %1209 = vmatprep.subr.bf16.mxu0 %v1385_v62  ;;  %v761_v48 = vpop.f32.mrb[10].mxu1 }
 0x144   : > { %v1210_v49 = vpack.c.bf16 %v897_v45, %v896_v44  ;;  %v762_v50 = vadd.f32 %v1159_v4, %v761_v48  ;;  %v824_v51 = vadd.f32 %v823_v37, %v759_v46  ;;  %v763_v52 = vpop.f32.mrb[11].mxu1 }
 0x146   : > { %v890_v54 = vadd.f32 %v869_v53, %v824_v51  ;;  %v827_v55 = vadd.f32 %v826_v42, %v762_v50  ;;  %1211 = vmatpush3.bf16.msra.mxu0 %v1210_v49 }
 0x147   : > { %1212 = vmatprep.subr.bf16.mxu0 %v1385_v62 }
 0x148   : > { %v891_v57 = vadd.f32 %v874_v56, %v827_v55  ;;  %v898_v59 = vmax.f32 %v890_v54, 0.0 }
 0x149   : > { %v766_v58 = vpop.f32.mrb[12].mxu1 }
 0x14a   : > { %v899_v60 = vmax.f32 %v891_v57, 0.0  ;;  %v767_v61 = vadd.f32 %v766_v58, %v482_v7  ;;  %v768_v63 = vpop.f32.mrb[13].mxu1 }
 0x14b   : > { %v769_v0 = vpop.f32.mrb[14].mxu1 }
 0x14c   : > { %v1213_v1 = vpack.c.bf16 %v899_v60, %v898_v59  ;;  %v832_v2 = vadd.f32 %v1185_v34, %v767_v61  ;;  %v770_v3 = vadd.f32 %v1626_v6, %v769_v0  ;;  %v771_v4 = vpop.f32.mrb[15].mxu1  ;;  %v904_v6 = vstv %s903_s23 }
 0x14e   : > { %v892_v8 = vadd.f32 %v879_v5, %v832_v2  ;;  %v835_v9 = vadd.f32 %v1186_v40, %v770_v3  ;;  %1214 = vmatpush3.bf16.msra.mxu0 %v1213_v1 }
 0x14f   : > { %1215 = vmatprep.subr.bf16.mxu0 %v1385_v62 }
 0x150   : > { %v893_v11 = vadd.f32 %v884_v10, %v835_v9  ;;  %v900_v12 = vmax.f32 %v892_v8, 0.0 }
 0x152   : > { %v901_v13 = vmax.f32 %v893_v11, 0.0 }
 0x154   : > { %v1216_v7 = vpack.c.bf16 %v901_v13, %v900_v12 }
 0x156   : > { %1217 = vmatpush3.bf16.msra.mxu0 %v1216_v7 }
 0x159   : > { %1204 = vmatmul.mubr.msk.f32.vlgmr.msra.gmra.mrb[16].mxu0 %vm671_vm2, %v902_v14 }
 0x22c   : > { %v974_v15 = vpop.f32.mrb[16].mxu0 }
 0x22d   : > { %v975_v62 = vadd.f32 %v974_v15, %v904_v6  ;;  %v1205_v16 = vpop.f32.mrb[17].mxu0 }
 0x22f   : > { %978 = vst [vmem:[%s287_s25] sm:$0x1] %v975_v62 }
 0x230   : > { %1333 = shalt.err (!%p1330_p4)
}
 0x231   : > { %s1334_s14 = scalar_lea.hbm %s1641_s15, 16  ;;  %s1338_s6 = scalar_lea.hbm %s1690_s7, 32 }
 0x232   : > { %p1335_p7 = scmp.ne.s32.totalorder %s1641_s15, %s1334_s14  ;;  %p1339_p10 = scmp.lt.u32.totalorder %s1641_s15, %s1690_s7 }
 0x233   : > { %p1340_p11 = scmp.lt.u32.totalorder %s1338_s6, %s1334_s14  ;;  %p1342_p13 = scmp.lt.u32.totalorder %s1334_s14, %s1641_s15 }
 0x234   : > { %p1336_p8 = pnand %p1335_p7, %p1467_p5 }
 0x235   : > { %p1341_p12 = por %p1340_p11, %p1339_p10 }
 0x236   : > { %p1337_p9 = pneg %p1336_p8 }
 0x237   : > { %p1343_p0 = por %p1342_p13, %p1341_p12 }
 0x239   : > { %p1344_p1 = pnand %p1343_p0, %p1337_p9 }
 0x23b   : > { %1347 = shalt.err (!%p1344_p1)
}
 0x23c   : > { %1227 = dma.vmem_to_hbm [thread:$0]  (%p1467_p5), %s1643_s30, 16, %s1641_s15, %s980_s16  }
 0x23d PF: > { %p1233_p2 = scmp.ge.s32.totalorder %s1382_s29, 2  ;;  %s1004_s25 = sand.u32 1, %s1370_s26  }
 0x23e   : > { %s1005_s9 = scalar_lea.sflag [#allocation4], %s1004_s25 }
 0x23f   : > { %p1230_p3 = pnand %p1233_p2, %p1471_p6 }
 0x241   : > { %1365 = dma.done.wait (!%p1230_p3), %s1005_s9, 16  }
 0x242   : > { %1367 = vsyncadd (!%p1230_p3), %s1005_s9, 4294967280  ;;  %p18_p4 = scmp.ge.s32.totalorder %s1455_s8, 4   ;;  %s1693_s26 = smov %s1374_s27 }
 0x243   : > { %s1694_s27 = smov %s1378_s28  ;;  %s1695_s28 = smov %s1465_s11 }
 0x244   : > { %s1696_s29 = smov %s1455_s8  ;;  %20 = sbr.rel (!%p18_p4) target bundleno = 5 (0x5), region = 86 }
 0x24b   :  { %1009 = vsyncpa [#allocation4], 1 }
 0x24c   :  { %1011 = vsyncpa [#allocation4 + $0x1], 1 }

</bundles_post_ra>
